<compile_context>
chip_gen: v7x
topology: tpu7x:2x2x1
jax: 0.10.0
libtpu: 0.0.40
codegen_flags: <defaults>
</compile_context>

<pallas_src>
import functools

import jax
import jax.numpy as jnp
import numpy as np
from jax import lax
from jax.experimental import pallas as pl
from jax.experimental.pallas import tpu as pltpu


def _round_up(x, m):
    return ((x + m - 1) // m) * m


def _sublane_multiple(dtype):
    # 8 for 4-byte, 16 for 2-byte (bf16), 32 for 1-byte dtypes.
    return max(8, 32 // jnp.dtype(dtype).itemsize)


def _supcon_kernel(anchor_ref, contrast_ref, lab_col_ref, lab_row_ref, o_ref,
                   m_ref, d_ref, sm_ref, sml_ref, *, n_valid, loss_scale):
    # anchor_ref:   [TM, D]  anchor row tile (constant across the column axis)
    # contrast_ref: [TN, D]  streamed contrast column tile
    # lab_col_ref:  [TM, 1]  int32 labels for the anchor rows
    # lab_row_ref:  [1, TN]  int32 labels for the contrast columns
    # o_ref:        [TM, 1]  per-anchor-row loss (written at the last column step)
    # scratch:      [TM, 1]  f32 running max / exp-sum / sum_m / sum(m*raw_logits)
    j = pl.program_id(1)

    @pl.when(j == 0)
    def _init():
        m_ref[...] = jnp.full_like(m_ref, -jnp.inf)
        d_ref[...] = jnp.zeros_like(d_ref)
        sm_ref[...] = jnp.zeros_like(sm_ref)
        sml_ref[...] = jnp.zeros_like(sml_ref)

    # NT gram block on the MXU: (TM, D) x (TN, D)^T -> (TM, TN), f32 accumulate.
    # 1/temperature is already folded into the features, so no N^2 scale here.
    logits = lax.dot_general(
        anchor_ref[...], contrast_ref[...],
        dimension_numbers=(((1,), (1,)), ((), ())),
        preferred_element_type=jnp.float32)

    tm, tn = logits.shape
    row_g = jax.lax.broadcasted_iota(jnp.int32, (tm, 1), 0) + pl.program_id(0) * tm
    col_g = jax.lax.broadcasted_iota(jnp.int32, (1, tn), 1) + j * tn
    is_diag = row_g == col_g                           # [TM, TN] via broadcast
    kill = jnp.logical_or(is_diag, col_g >= n_valid)   # self-contrast + padded cols

    # Online max / exp-sum update.  Padded columns contribute raw logit 0, which
    # never exceeds the diagonal logit (>= 0), so they cannot perturb the running
    # max; the max is only a stabilizer and cancels exactly in the final LSE.
    m_prev = m_ref[...]
    m_new = jnp.maximum(m_prev, jnp.max(logits, axis=1, keepdims=True))
    p = jnp.where(kill, 0.0, jnp.exp(logits - m_new))
    d_ref[...] = d_ref[...] * jnp.exp(m_prev - m_new) + jnp.sum(p, axis=1,
                                                                keepdims=True)
    m_ref[...] = m_new

    # Positive-pair mask from labels; diagonal and padded columns removed via the
    # (label-independent) `kill` mask, so padding labels can never collide.
    pos = jnp.logical_and(lab_col_ref[...] == lab_row_ref[...],
                          jnp.logical_not(kill))
    sm_ref[...] += jnp.sum(pos.astype(jnp.float32), axis=1, keepdims=True)
    # Accumulate sum(m * RAW logits); no online rescale needed for this term.
    sml_ref[...] += jnp.sum(jnp.where(pos, logits, 0.0), axis=1, keepdims=True)

    @pl.when(j == pl.num_programs(1) - 1)
    def _finalize():
        # sum(m*log_prob) = sum(m*raw_logits) - sum_m * (row_max + log(exp_sum))
        lse = m_ref[...] + jnp.log(d_ref[...])
        sm = sm_ref[...]
        # Rows with zero positives yield NaN (0/0), matching the PyTorch ref;
        # padded anchor rows are dropped in the wrapper.
        mean_log_prob_pos = (sml_ref[...] - sm * lse) / sm
        o_ref[...] = (-jnp.float32(loss_scale)) * mean_log_prob_pos


def supcon_loss(features, labels=None, temperature=0.07, base_temperature=0.07,
                block_rows=None, block_cols=None):
    """Pallas implementation of SupConLoss.forward (contrast_mode='all').

    Args:
      features: [bsz, n_views, ...] float array (f32 or bf16; bf16 stays bf16
        into the MXU with f32 accumulation).
      labels:   [bsz] int array, or None for the SimCLR (eye-mask) case.
      block_rows / block_cols: anchor-row / contrast-column tile sizes.
    Returns:
      scalar f32 loss.
    """
    features = jnp.asarray(features)
    if features.ndim < 3:
        raise ValueError("`features` needs to be [bsz, n_views, ...]")
    if features.ndim > 3:
        features = features.reshape(features.shape[0], features.shape[1], -1)
    bsz, n_views, dim = features.shape
    n = bsz * n_views

    if labels is None:
        labels = jnp.arange(bsz, dtype=jnp.int32)   # eye mask == SimCLR case
    labels = jnp.asarray(labels, jnp.int32).reshape(-1)

    # contrast_feature = cat(unbind(features, dim=1), dim=0): view-major rows.
    # Fold 1/temperature into the features (1/sqrt(T) on each side of the gram
    # matrix) so the kernel never scales the N x N logits.
    inv_sqrt_t = 1.0 / float(np.sqrt(temperature))
    contrast = (jnp.transpose(features, (1, 0, 2)) * inv_sqrt_t).reshape(n, dim)
    lab = jnp.tile(labels, (n_views,))              # view-tiled labels, length n

    sub = _sublane_multiple(contrast.dtype)
    if block_rows is None:
        # Default: at most 256, at least 2 row blocks when possible (v7x megacore).
        block_rows = min(256, _round_up(max((n + 1) // 2, 1), sub))
    block_rows = _round_up(block_rows, sub)
    n_row_pad = _round_up(n, block_rows)

    if block_cols is None:
        block_cols = 512                            # keep per-tile chain vreg-sized
    block_cols = min(_round_up(block_cols, 128), _round_up(n, 128))
    n_col_pad = _round_up(n, block_cols)

    # One shared feature array covers both the row-tiled (anchor) and the
    # column-tiled (contrast) views; pad rows are zeros.
    n_all_pad = max(n_row_pad, n_col_pad)
    if n_all_pad != n:
        contrast = jnp.concatenate(
            [contrast, jnp.zeros((n_all_pad - n, dim), contrast.dtype)], axis=0)

    lab_col = lab
    if n_row_pad != n:
        lab_col = jnp.concatenate(
            [lab_col, jnp.full((n_row_pad - n,), -1, jnp.int32)])
    lab_col = lab_col.reshape(n_row_pad, 1)

    lab_row = lab
    if n_col_pad != n:
        lab_row = jnp.concatenate(
            [lab_row, jnp.full((n_col_pad - n,), -1, jnp.int32)])
    lab_row = lab_row.reshape(1, n_col_pad)

    kernel = functools.partial(
        _supcon_kernel,
        n_valid=n,
        loss_scale=float(temperature) / float(base_temperature),
    )

    grid = (n_row_pad // block_rows, n_col_pad // block_cols)
    grid_spec = pltpu.PrefetchScalarGridSpec(
        num_scalar_prefetch=0,
        grid=grid,
        in_specs=[
            pl.BlockSpec((block_rows, dim), lambda i, j: (i, 0)),   # anchor rows
            pl.BlockSpec((block_cols, dim), lambda i, j: (j, 0)),   # contrast cols
            pl.BlockSpec((block_rows, 1), lambda i, j: (i, 0)),     # anchor labels
            pl.BlockSpec((1, block_cols), lambda i, j: (0, j)),     # contrast labels
        ],
        out_specs=pl.BlockSpec((block_rows, 1), lambda i, j: (i, 0)),
        scratch_shapes=[pltpu.VMEM((block_rows, 1), jnp.float32)] * 4,
    )

    # Size the scoped VMEM limit from the actual working set (double-buffered
    # tiles + f32 intermediates), clamped to [32 MiB, 64 MiB] (v7x-safe).
    feat_bytes = jnp.dtype(contrast.dtype).itemsize
    est = (2 * (block_rows + block_cols) * dim * feat_bytes
           + 2 * (block_rows + block_cols) * 4
           + (2 + 4) * block_rows * 4
           + 8 * block_rows * block_cols * 4)
    vmem_limit = int(min(64 * 1024 * 1024, max(32 * 1024 * 1024, 2 * est)))

    per_row = pl.pallas_call(
        kernel,
        grid_spec=grid_spec,
        out_shape=jax.ShapeDtypeStruct((n_row_pad, 1), jnp.float32),
        compiler_params=pltpu.CompilerParams(
            dimension_semantics=("parallel", "arbitrary"),
            vmem_limit_bytes=vmem_limit,
        ),
    )(contrast, contrast, lab_col, lab_row)

    # loss.view(anchor_count, batch_size).mean() == mean over all N anchor rows.
    return jnp.mean(per_row[:n, 0])


def _supcon_loss_ref(features, labels, temperature=0.07, base_temperature=0.07):
    """Pure-numpy reference mirroring the PyTorch code."""
    features = np.asarray(features, dtype=np.float32)
    labels = np.asarray(labels)
    bsz, n_views, dim = features.shape
    n = bsz * n_views
    contrast = np.transpose(features, (1, 0, 2)).reshape(n, dim)
    mask = (labels.reshape(-1, 1) == labels.reshape(1, -1)).astype(np.float32)
    mask = np.tile(mask, (n_views, n_views))
    logits = contrast @ contrast.T / temperature
    logits = logits - logits.max(axis=1, keepdims=True)
    logits_mask = np.ones((n, n), np.float32) - np.eye(n, dtype=np.float32)
    mask = mask * logits_mask
    exp_logits = np.exp(logits) * logits_mask
    log_prob = logits - np.log(exp_logits.sum(1, keepdims=True))
    mean_log_prob_pos = (mask * log_prob).sum(1) / mask.sum(1)
    loss = -(temperature / base_temperature) * mean_log_prob_pos
    return loss.reshape(n_views, bsz).mean()


if __name__ == "__main__":
    key = jax.random.PRNGKey(0)

    # --- Test A: small shapes, default tiling (2 row blocks, 1 column block) ---
    kf, kl, key = jax.random.split(key, 3)
    bsz, n_views, dim = 8, 2, 32
    feats_a = jax.random.normal(kf, (bsz, n_views, dim), dtype=jnp.float32)
    feats_a = feats_a / jnp.linalg.norm(feats_a, axis=-1, keepdims=True)
    labels_a = jax.random.randint(kl, (bsz,), 0, 3, dtype=jnp.int32)

    loss_a = jax.block_until_ready(
        supcon_loss(feats_a, labels_a, temperature=0.07, base_temperature=0.07))
    ref_a = _supcon_loss_ref(np.asarray(feats_a), np.asarray(labels_a))
    np.testing.assert_allclose(np.asarray(loss_a), ref_a, rtol=1e-4, atol=1e-5)

    # --- Test B: exercises multi-row AND multi-column (online softmax) tiling,
    #             with padding in both the row and the column dimensions. -------
    kf, kl = jax.random.split(key)
    bsz, n_views, dim = 72, 2, 32            # n = 144 -> rows pad 192, cols pad 256
    feats_b = jax.random.normal(kf, (bsz, n_views, dim), dtype=jnp.float32)
    feats_b = feats_b / jnp.linalg.norm(feats_b, axis=-1, keepdims=True)
    labels_b = jax.random.randint(kl, (bsz,), 0, 4, dtype=jnp.int32)

    loss_b = jax.block_until_ready(
        supcon_loss(feats_b, labels_b, temperature=0.07, base_temperature=0.07,
                    block_rows=64, block_cols=128))   # grid = (3, 2)
    ref_b = _supcon_loss_ref(np.asarray(feats_b), np.asarray(labels_b))
    np.testing.assert_allclose(np.asarray(loss_b), ref_b, rtol=1e-4, atol=1e-5)

    print("KERNEL_OK")
</pallas_src>

<mosaic_0001>
module attributes {stable_mosaic.version = 11 : i64} {
  func.func @_supcon_kernel(%arg0: i32, %arg1: i32, %arg2: memref<8x32xf32, #tpu.memory_space<vmem>>, %arg3: memref<128x32xf32, #tpu.memory_space<vmem>>, %arg4: memref<8x1xi32, #tpu.memory_space<vmem>>, %arg5: memref<1x128xi32, #tpu.memory_space<vmem>>, %arg6: memref<8x1xf32, #tpu.memory_space<vmem>>, %arg7: memref<8x1xf32, #tpu.memory_space<vmem>>, %arg8: memref<8x1xf32, #tpu.memory_space<vmem>>, %arg9: memref<8x1xf32, #tpu.memory_space<vmem>>, %arg10: memref<8x1xf32, #tpu.memory_space<vmem>>) attributes {dimension_semantics = [#tpu.dimension_semantics<parallel>, #tpu.dimension_semantics<arbitrary>], iteration_bounds = array<i64: 2, 1>, scalar_prefetch = 0 : i64, scratch_operands = 4 : i64, tpu.core_type = #tpu.core_type<tc>, window_params = [{transform_indices = @transform_0, window_bounds = array<i64: 8, 32>}, {transform_indices = @transform_1, window_bounds = array<i64: 128, 32>}, {transform_indices = @transform_2, window_bounds = array<i64: 8, 1>}, {transform_indices = @transform_3, window_bounds = array<i64: 1, 128>}, {transform_indices = @transform_4, window_bounds = array<i64: 8, 1>}]} {
    %c0_i32 = arith.constant 0 : i32
    %0 = arith.cmpi eq, %arg1, %c0_i32 : i32
    %1 = arith.extui %0 : i1 to i32
    %c0_i32_0 = arith.constant 0 : i32
    %2 = arith.cmpi ne, %1, %c0_i32_0 : i32
    scf.if %2 {
      %cst_33 = arith.constant 0xFF800000 : f32
      %63 = vector.broadcast %cst_33 : f32 to vector<8x1xf32>
      %c0_34 = arith.constant 0 : index
      %c0_35 = arith.constant 0 : index
      %64 = vector.load %arg7[%c0_34, %c0_35] : memref<8x1xf32, #tpu.memory_space<vmem>>, vector<8x1xf32>
      tpu.vector_store %arg7[%c0_34, %c0_35], %63 {strides = array<i32>} : memref<8x1xf32, #tpu.memory_space<vmem>>, vector<8x1xf32>,
      %cst_36 = arith.constant 0.000000e+00 : f32
      %65 = vector.broadcast %cst_36 : f32 to vector<8x1xf32>
      %c0_37 = arith.constant 0 : index
      %c0_38 = arith.constant 0 : index
      %66 = vector.load %arg8[%c0_37, %c0_38] : memref<8x1xf32, #tpu.memory_space<vmem>>, vector<8x1xf32>
      tpu.vector_store %arg8[%c0_37, %c0_38], %65 {strides = array<i32>} : memref<8x1xf32, #tpu.memory_space<vmem>>, vector<8x1xf32>,
      %cst_39 = arith.constant 0.000000e+00 : f32
      %67 = vector.broadcast %cst_39 : f32 to vector<8x1xf32>
      %c0_40 = arith.constant 0 : index
      %c0_41 = arith.constant 0 : index
      %68 = vector.load %arg9[%c0_40, %c0_41] : memref<8x1xf32, #tpu.memory_space<vmem>>, vector<8x1xf32>
      tpu.vector_store %arg9[%c0_40, %c0_41], %67 {strides = array<i32>} : memref<8x1xf32, #tpu.memory_space<vmem>>, vector<8x1xf32>,
      %cst_42 = arith.constant 0.000000e+00 : f32
      %69 = vector.broadcast %cst_42 : f32 to vector<8x1xf32>
      %c0_43 = arith.constant 0 : index
      %c0_44 = arith.constant 0 : index
      %70 = vector.load %arg10[%c0_43, %c0_44] : memref<8x1xf32, #tpu.memory_space<vmem>>, vector<8x1xf32>
      tpu.vector_store %arg10[%c0_43, %c0_44], %69 {strides = array<i32>} : memref<8x1xf32, #tpu.memory_space<vmem>>, vector<8x1xf32>,
    } else {
    }
    %c0 = arith.constant 0 : index
    %c0_1 = arith.constant 0 : index
    %3 = vector.load %arg2[%c0, %c0_1] : memref<8x32xf32, #tpu.memory_space<vmem>>, vector<8x32xf32>
    %c0_2 = arith.constant 0 : index
    %c0_3 = arith.constant 0 : index
    %4 = vector.load %arg3[%c0_2, %c0_3] : memref<128x32xf32, #tpu.memory_space<vmem>>, vector<128x32xf32>
    %cst = arith.constant dense<0.000000e+00> : vector<8x128xf32>
    %5 = tpu.matmul %3, %4, %cst {dimension_numbers = #tpu.dot_dimension_numbers<[1], [1], [0], [0], [0, 0, 1, 0], [], []>} : vector<8x32xf32>, vector<128x32xf32>, vector<8x128xf32> -> vector<8x128xf32>
    %6 = tpu.iota {dimensions = array<i32: 0>} : vector<8x1xi32>
    %c8_i32 = arith.constant 8 : i32
    %7 = arith.muli %arg0, %c8_i32 : i32
    %8 = vector.broadcast %7 : i32 to vector<8x1xi32>
    %9 = arith.addi %6, %8 : vector<8x1xi32>
    %10 = tpu.iota {dimensions = array<i32: 1>} : vector<1x128xi32>
    %c128_i32 = arith.constant 128 : i32
    %11 = arith.muli %arg1, %c128_i32 : i32
    %12 = vector.broadcast %11 : i32 to vector<1x128xi32>
    %13 = arith.addi %10, %12 : vector<1x128xi32>
    %14 = vector.broadcast %9 : vector<8x1xi32> to vector<8x128xi32>
    %15 = vector.broadcast %13 : vector<1x128xi32> to vector<8x128xi32>
    %16 = arith.cmpi eq, %14, %15 : vector<8x128xi32>
    %c16_i32 = arith.constant 16 : i32
    %17 = vector.broadcast %c16_i32 : i32 to vector<1x128xi32>
    %18 = arith.cmpi sge, %13, %17 : vector<1x128xi32>
    %19 = vector.broadcast %18 : vector<1x128xi1> to vector<8x128xi1>
    %20 = arith.ori %16, %19 : vector<8x128xi1>
    %c0_4 = arith.constant 0 : index
    %c0_5 = arith.constant 0 : index
    %21 = vector.load %arg7[%c0_4, %c0_5] : memref<8x1xf32, #tpu.memory_space<vmem>>, vector<8x1xf32>
    %cst_6 = arith.constant dense<0xFF800000> : vector<8xf32>
    %22 = vector.multi_reduction <maximumf>, %5, %cst_6 [1] : vector<8x128xf32> to vector<8xf32>
    %23 = vector.shape_cast %22 : vector<8xf32> to vector<8x1xf32>
    %24 = arith.maximumf %21, %23 : vector<8x1xf32>
    %25 = vector.broadcast %24 : vector<8x1xf32> to vector<8x128xf32>
    %26 = arith.subf %5, %25 : vector<8x128xf32>
    %27 = math.exp %26 : vector<8x128xf32>
    %cst_7 = arith.constant 0.000000e+00 : f32
    %28 = vector.broadcast %cst_7 : f32 to vector<8x128xf32>
    %29 = arith.select %20, %28, %27 : vector<8x128xi1>, vector<8x128xf32>
    %c0_8 = arith.constant 0 : index
    %c0_9 = arith.constant 0 : index
    %30 = vector.load %arg8[%c0_8, %c0_9] : memref<8x1xf32, #tpu.memory_space<vmem>>, vector<8x1xf32>
    %31 = arith.subf %21, %24 : vector<8x1xf32>
    %32 = math.exp %31 : vector<8x1xf32>
    %33 = arith.mulf %30, %32 : vector<8x1xf32>
    %cst_10 = arith.constant dense<0.000000e+00> : vector<8xf32>
    %34 = vector.multi_reduction <add>, %29, %cst_10 [1] : vector<8x128xf32> to vector<8xf32>
    %35 = vector.shape_cast %34 : vector<8xf32> to vector<8x1xf32>
    %36 = arith.addf %33, %35 : vector<8x1xf32>
    %c0_11 = arith.constant 0 : index
    %c0_12 = arith.constant 0 : index
    %37 = vector.load %arg8[%c0_11, %c0_12] : memref<8x1xf32, #tpu.memory_space<vmem>>, vector<8x1xf32>
    tpu.vector_store %arg8[%c0_11, %c0_12], %36 {strides = array<i32>} : memref<8x1xf32, #tpu.memory_space<vmem>>, vector<8x1xf32>,
    %c0_13 = arith.constant 0 : index
    %c0_14 = arith.constant 0 : index
    %38 = vector.load %arg7[%c0_13, %c0_14] : memref<8x1xf32, #tpu.memory_space<vmem>>, vector<8x1xf32>
    tpu.vector_store %arg7[%c0_13, %c0_14], %24 {strides = array<i32>} : memref<8x1xf32, #tpu.memory_space<vmem>>, vector<8x1xf32>,
    %c0_15 = arith.constant 0 : index
    %c0_16 = arith.constant 0 : index
    %39 = vector.load %arg4[%c0_15, %c0_16] : memref<8x1xi32, #tpu.memory_space<vmem>>, vector<8x1xi32>
    %c0_17 = arith.constant 0 : index
    %c0_18 = arith.constant 0 : index
    %40 = vector.load %arg5[%c0_17, %c0_18] : memref<1x128xi32, #tpu.memory_space<vmem>>, vector<1x128xi32>
    %41 = vector.broadcast %39 : vector<8x1xi32> to vector<8x128xi32>
    %42 = vector.broadcast %40 : vector<1x128xi32> to vector<8x128xi32>
    %43 = arith.cmpi eq, %41, %42 : vector<8x128xi32>
    %cst_19 = arith.constant dense<true> : vector<8x128xi1>
    %44 = arith.xori %20, %cst_19 : vector<8x128xi1>
    %45 = arith.andi %43, %44 : vector<8x128xi1>
    %c0_20 = arith.constant 0 : index
    %c0_21 = arith.constant 0 : index
    %46 = vector.load %arg9[%c0_20, %c0_21] : memref<8x1xf32, #tpu.memory_space<vmem>>, vector<8x1xf32>
    %47 = arith.extui %45 : vector<8x128xi1> to vector<8x128xi32>
    %48 = arith.sitofp %47 : vector<8x128xi32> to vector<8x128xf32>
    %cst_22 = arith.constant dense<0.000000e+00> : vector<8xf32>
    %49 = vector.multi_reduction <add>, %48, %cst_22 [1] : vector<8x128xf32> to vector<8xf32>
    %50 = vector.shape_cast %49 : vector<8xf32> to vector<8x1xf32>
    %51 = arith.addf %46, %50 : vector<8x1xf32>
    %c0_23 = arith.constant 0 : index
    %c0_24 = arith.constant 0 : index
    %52 = vector.load %arg9[%c0_23, %c0_24] : memref<8x1xf32, #tpu.memory_space<vmem>>, vector<8x1xf32>
    tpu.vector_store %arg9[%c0_23, %c0_24], %51 {strides = array<i32>} : memref<8x1xf32, #tpu.memory_space<vmem>>, vector<8x1xf32>,
    %c0_25 = arith.constant 0 : index
    %c0_26 = arith.constant 0 : index
    %53 = vector.load %arg10[%c0_25, %c0_26] : memref<8x1xf32, #tpu.memory_space<vmem>>, vector<8x1xf32>
    %cst_27 = arith.constant 0.000000e+00 : f32
    %54 = vector.broadcast %cst_27 : f32 to vector<8x128xf32>
    %55 = arith.select %45, %5, %54 : vector<8x128xi1>, vector<8x128xf32>
    %cst_28 = arith.constant dense<0.000000e+00> : vector<8xf32>
    %56 = vector.multi_reduction <add>, %55, %cst_28 [1] : vector<8x128xf32> to vector<8xf32>
    %57 = vector.shape_cast %56 : vector<8xf32> to vector<8x1xf32>
    %58 = arith.addf %53, %57 : vector<8x1xf32>
    %c0_29 = arith.constant 0 : index
    %c0_30 = arith.constant 0 : index
    %59 = vector.load %arg10[%c0_29, %c0_30] : memref<8x1xf32, #tpu.memory_space<vmem>>, vector<8x1xf32>
    tpu.vector_store %arg10[%c0_29, %c0_30], %58 {strides = array<i32>} : memref<8x1xf32, #tpu.memory_space<vmem>>, vector<8x1xf32>,
    %c0_i32_31 = arith.constant 0 : i32
    %60 = arith.cmpi eq, %arg1, %c0_i32_31 : i32
    %61 = arith.extui %60 : i1 to i32
    %c0_i32_32 = arith.constant 0 : i32
    %62 = arith.cmpi ne, %61, %c0_i32_32 : i32
    scf.if %62 {
      %c0_33 = arith.constant 0 : index
      %c0_34 = arith.constant 0 : index
      %63 = vector.load %arg7[%c0_33, %c0_34] : memref<8x1xf32, #tpu.memory_space<vmem>>, vector<8x1xf32>
      %c0_35 = arith.constant 0 : index
      %c0_36 = arith.constant 0 : index
      %64 = vector.load %arg8[%c0_35, %c0_36] : memref<8x1xf32, #tpu.memory_space<vmem>>, vector<8x1xf32>
      %65 = math.log %64 : vector<8x1xf32>
      %66 = arith.addf %63, %65 : vector<8x1xf32>
      %c0_37 = arith.constant 0 : index
      %c0_38 = arith.constant 0 : index
      %67 = vector.load %arg9[%c0_37, %c0_38] : memref<8x1xf32, #tpu.memory_space<vmem>>, vector<8x1xf32>
      %c0_39 = arith.constant 0 : index
      %c0_40 = arith.constant 0 : index
      %68 = vector.load %arg10[%c0_39, %c0_40] : memref<8x1xf32, #tpu.memory_space<vmem>>, vector<8x1xf32>
      %69 = arith.mulf %67, %66 : vector<8x1xf32>
      %70 = arith.subf %68, %69 : vector<8x1xf32>
      %71 = arith.divf %70, %67 : vector<8x1xf32>
      %cst_41 = arith.constant 0.000000e+00 : f32
      %cst_42 = arith.constant 1.000000e+00 : f32
      %72 = arith.subf %cst_41, %cst_42 : f32
      %73 = vector.broadcast %72 : f32 to vector<8x1xf32>
      %74 = arith.mulf %73, %71 : vector<8x1xf32>
      %c0_43 = arith.constant 0 : index
      %c0_44 = arith.constant 0 : index
      %75 = vector.load %arg6[%c0_43, %c0_44] : memref<8x1xf32, #tpu.memory_space<vmem>>, vector<8x1xf32>
      tpu.vector_store %arg6[%c0_43, %c0_44], %74 {strides = array<i32>} : memref<8x1xf32, #tpu.memory_space<vmem>>, vector<8x1xf32>,
    } else {
    }
    return
  }
  func.func @transform_0(%arg0: i32, %arg1: i32) -> (i32, i32) {
    %c0_i32 = arith.constant 0 : i32
    %c0_i32_0 = arith.constant 0 : i32
    return %arg0, %c0_i32 : i32, i32
  }
  func.func @transform_1(%arg0: i32, %arg1: i32) -> (i32, i32) {
    %c0_i32 = arith.constant 0 : i32
    %c0_i32_0 = arith.constant 0 : i32
    return %arg1, %c0_i32 : i32, i32
  }
  func.func @transform_2(%arg0: i32, %arg1: i32) -> (i32, i32) {
    %c0_i32 = arith.constant 0 : i32
    %c0_i32_0 = arith.constant 0 : i32
    return %arg0, %c0_i32 : i32, i32
  }
  func.func @transform_3(%arg0: i32, %arg1: i32) -> (i32, i32) {
    %c0_i32 = arith.constant 0 : i32
    %c0_i32_0 = arith.constant 0 : i32
    return %c0_i32, %arg1 : i32, i32
  }
  func.func @transform_4(%arg0: i32, %arg1: i32) -> (i32, i32) {
    %c0_i32 = arith.constant 0 : i32
    %c0_i32_0 = arith.constant 0 : i32
    return %arg0, %c0_i32 : i32, i32
  }
}

</mosaic_0001>

<bundles_post_ra>
// kernel: tpu_custom_call.1
= control target key start
LH: loop header
LB: loop body
LE: loop exit
PB: predicated region body
PF: predicated region fallthrough
CT: control target
= control target key end

     0   :  { %s798_s15 = smov 0   ;;  %s800_s16 = smov 0   ;;  %s936_s0 = inlined_call_operand.vmem [shape: f32[128,32], index: 0, kind: input, shape index: {}]   ;;  %s937_s1 = inlined_call_operand.vmem [shape: f32[128,32], index: 1, kind: input, shape index: {}]   ;;  %s938_s2 = inlined_call_operand.vmem [shape: s32[16,1], index: 2, kind: input, shape index: {}]   ;;  %s939_s3 = inlined_call_operand.vmem [shape: s32[1,128], index: 3, kind: input, shape index: {}]   ;;  %s940_s4 = inlined_call_operand.vmem [shape: f32[16,1], index: 4, kind: output, shape index: {}]  }
   0x1   :  { %s802_s17 = smov 0  }
   0x2 LB: > { %s26_s18 = sadd.s32 1, %s761_s16  ;;  %p593_p0 = scmp.ge.s32.totalorder %s765_s17, 1  ;;  %s765_s17 = sphi %s802_s17, %s14_s17   ;;  %s761_s16 = sphi %s800_s16, %s944_s16   ;;  %s757_s15 = sphi %s798_s15, %s943_s15  }
   0x3   : > { %p28_p1 = scmp.ge.s32.totalorder %s26_s18, 2  ;;  %p201_p2 = scmp.lt.s32.totalorder %s765_s17, 3 }
   0x5   : > { %s946_s18 = smov (%p28_p1, %s26_s18), 0  ;;  %p202_p3 = pnand %p593_p0, %p201_p2 }
   0x6   : > { %v268_v0 = vld [vmem:[%s937_s1] sm:$0xff] (!%p202_p3)  ;;  %v269_v1 = vld [vmem:[%s937_s1 + $0x8] sm:$0xff] (!%p202_p3)  ;;  %vm284_vm0 = vcmask (!%p202_p3), 261120   ;;  %v767_v2 = vmov (!%p202_p3), 0.0|0.0   ;;  %p247_p4 = scmp.lt.s32.totalorder (!%p202_p3), %s757_s15, 1  ;;  %vm768_vm2 = vmmov (!%p202_p3), 0   ;;  %v406_v37 = vlaneseq (!%p202_p3) }
   0x7   : > { %205 = sbr.rel (%p202_p3) target bundleno = 748 (0x2ec), region = 36  ;;  %671 = vmatprep.subr.bf16.mxu0 (!%p202_p3), %v767_v2  ;;  %v672_v3 = vpack.c.bf16 (!%p202_p3), %v269_v1, %v268_v0  ;;  %vm826_vm1 = vmpackc.low (!%p202_p3), %vm284_vm0, %vm284_vm0  ;;  %v769_v5 = vmov (!%p202_p3), 0.0   ;;  %v770_v6 = vmov (!%p202_p3), 0   ;;  %v270_v7 = vld [vmem:[%s937_s1 + $0x10] sm:$0xff] (!%p202_p3)  ;;  %v271_v8 = vld [vmem:[%s937_s1 + $0x18] sm:$0xff] (!%p202_p3)  ;;  %p237_p5 = scmp.lt.s32.totalorder (!%p202_p3), %s757_s15, 15 }
   0x8   : > { %668 = vmatprep.mubr.msk.f32.mxu0 (!%p202_p3), %vm768_vm2, %v769_v5  ;;  %734 = vset.pattern.permute.xlu1 (!%p202_p3), %v770_v6  ;;  %v676_v9 = vpack.c.bf16 (!%p202_p3), %v271_v8, %v270_v7  ;;  %v272_v11 = vld [vmem:[%s937_s1 + $0x20] sm:$0xff] (!%p202_p3)  ;;  %v273_v12 = vld [vmem:[%s937_s1 + $0x28] sm:$0xff] (!%p202_p3)  ;;  %v274_v14 = vld [vmem:[%s937_s1 + $0x30] sm:$0xff] (!%p202_p3)  ;;  %vm262_vm3 = vcmask (!%p202_p3), 7168   ;;  %v771_v30 = vmov (!%p202_p3), -inf   ;;  %s614_s19 = sshll.u32 (!%p202_p3), %s757_s15, 3 }
   0x9   : > { %674 = vmatpush3.bf16.xpose.msk.msra.mxu0 (!%p202_p3), %vm826_vm1, %v672_v3  ;;  %733 = vset.pattern.permute.xlu0 (!%p202_p3), %v770_v6  ;;  %v680_v13 = vpack.c.bf16 (!%p202_p3), %v273_v12, %v272_v11  ;;  %v275_v15 = vld [vmem:[%s937_s1 + $0x38] sm:$0xff] (!%p202_p3)  ;;  %v276_v17 = vld [vmem:[%s937_s1 + $0x40] sm:$0xff] (!%p202_p3)  ;;  %v277_v18 = vld [vmem:[%s937_s1 + $0x48] sm:$0xff] (!%p202_p3)  ;;  %263 = vst.msk [vmem:[#allocation2] sm:$0xff] (!%p202_p3), %vm262_vm3, %v771_v30  ;;  %v407_v39 = vshrl.u32 (!%p202_p3), %v406_v37, 7  ;;  %v409_v41 = vstv (!%p202_p3), %s614_s19  ;;  %v412_v44 = vand.u32 (!%p202_p3), 127, %v406_v37 }
   0xa   : > { %675 = vmatprep.subr.bf16.mxu0 (!%p202_p3), %v767_v2  ;;  %v684_v16 = vpack.c.bf16 (!%p202_p3), %v275_v15, %v274_v14  ;;  %v688_v19 = vpack.c.bf16 (!%p202_p3), %v277_v18, %v276_v17  ;;  %v278_v20 = vld [vmem:[%s937_s1 + $0x50] sm:$0xff] (!%p202_p3)  ;;  %v279_v21 = vld [vmem:[%s937_s1 + $0x58] sm:$0xff] (!%p202_p3)  ;;  %v280_v23 = vld [vmem:[%s937_s1 + $0x60] sm:$0xff] (!%p202_p3)  ;;  %264 = vst.msk [vmem:[#allocation3] sm:$0xff] (!%p202_p3), %vm262_vm3, %v769_v5  ;;  %vm772_vm8 = vmmov (!%p202_p3), 1  }
   0xb   : > { %v692_v22 = vpack.c.bf16 (!%p202_p3), %v279_v21, %v278_v20  ;;  %v281_v24 = vld [vmem:[%s937_s1 + $0x68] sm:$0xff] (!%p202_p3)  ;;  %v282_v26 = vld [vmem:[%s937_s1 + $0x70] sm:$0xff] (!%p202_p3)  ;;  %v283_v27 = vld [vmem:[%s937_s1 + $0x78] sm:$0xff] (!%p202_p3)  ;;  %265 = vst.msk [vmem:[#allocation4] sm:$0xff] (!%p202_p3), %vm262_vm3, %v769_v5  ;;  %v410_v43 = vadd.s32 (!%p202_p3), %v409_v41, %v407_v39  ;;  %vm417_vm5 = vcmp.ge.s32.totalorder (!%p202_p3), %v412_v44, 16 }
   0xc   : > { %v696_v25 = vpack.c.bf16 (!%p202_p3), %v281_v24, %v280_v23  ;;  %v700_v28 = vpack.c.bf16 (!%p202_p3), %v283_v27, %v282_v26  ;;  %266 = vst.msk [vmem:[#allocation5] sm:$0xff] (!%p202_p3), %vm262_vm3, %v769_v5  ;;  %v615_v45 = vld [vmem:[%s939_s3] ss:$0 sm:$0xff] (!%p202_p3) }
   0xd   : > { %vm416_vm4 = vcmp.eq.s32.totalorder (!%p202_p3), %v410_v43, %v412_v44 }
   0xe   : > { %s841_s27 = scalar_select %p247_p4, %s757_s15, 1  ;;  %vm420_vm6 = vmor %vm416_vm4, %vm417_vm5 }
   0xf   : > { %s238_s10 = scalar_select %p237_p5, %s757_s15, 15  ;;  %vm455_vm9 = vmxor %vm420_vm6, %vm772_vm8 }
  0x10   : > { %s595_s28 = sshll.u32 %s841_s27, 3  ;;  %v421_v33 = vld [vmem:[#allocation2] sm:$0xff] }
  0x11   : > { %s250_s5 = scalar_lea.vmem %s938_s2, %s595_s28  ;;  %678 = vmatpush3.bf16.xpose.msk.msra.mxu0 %vm826_vm1, %v676_v9  ;;  %s594_s11 = sshll.u32 %s238_s10, 3  ;;  %v434_v53 = vld [vmem:[#allocation3] sm:$0xff] }
  0x12   : > { %v445_v10 = vld [vmem:[%s250_s5] sm:$0xff]  ;;  %679 = vmatprep.subr.bf16.mxu0 %v767_v2  ;;  %s240_s14 = scalar_lea.vmem %s936_s0, %s594_s11  ;;  %v457_v57 = vld [vmem:[#allocation4] sm:$0xff]  ;;  %s257_s23 = scalar_lea.vmem %s940_s4, %s595_s28 }
  0x13   : > { %448 = vperm.xlu1 %734, %v445_v10   ;;  %v267_v29 = vld [vmem:[%s240_s14] sm:$0xff]  ;;  %v464_v60 = vld [vmem:[#allocation5] sm:$0xff] }
  0x19   : > { %682 = vmatpush3.bf16.xpose.msk.msra.mxu0 %vm826_vm1, %v680_v13 }
  0x1a   : > { %683 = vmatprep.subr.bf16.mxu0 %v767_v2 }
  0x21   : > { %686 = vmatpush3.bf16.xpose.msk.msra.mxu0 %vm826_vm1, %v684_v16 }
  0x22   : > { %687 = vmatprep.subr.bf16.mxu0 %v767_v2 }
  0x29   : > { %690 = vmatpush3.bf16.xpose.msk.msra.mxu0 %vm826_vm1, %v688_v19 }
  0x2a   : > { %691 = vmatprep.subr.bf16.mxu0 %v767_v2 }
  0x31   : > { %694 = vmatpush3.bf16.xpose.msk.msra.mxu0 %vm826_vm1, %v692_v22 }
  0x32   : > { %695 = vmatprep.subr.bf16.mxu0 %v767_v2 }
  0x39   : > { %698 = vmatpush3.bf16.xpose.msk.msra.mxu0 %vm826_vm1, %v696_v25 }
  0x3a   : > { %699 = vmatprep.subr.bf16.mxu0 %v767_v2 }
  0x41   : > { %702 = vmatpush3.bf16.xpose.msk.msra.mxu0 %vm826_vm1, %v700_v28 }
  0x48   : > { %669 = vmatmul.mubr.msk.f32.vlgmr.msra.gmra.mrb[0].mxu0 %vm284_vm0, %v267_v29 }
  0x92   : > { %v449_v46 = vpop.permute.xlu1 %448 }
  0x93   : > { %vm454_vm7 = vcmp.eq.s32.totalorder %v449_v46, %v615_v45 }
  0x94   : > { %vm456_vm10 = vmand %vm454_vm7, %vm455_vm9 }
  0x95   : > { %v616_v49 = vsel %vm456_vm10, 1.0, %v769_v5 }
 0x11b   : > { %v402_v31 = vpop.f32.mrb[0].mxu0 }
 0x11c   : > { %422 = vmax.xlane.f32.xlu0 %v402_v31  ;;  %v670_v32 = vpop.f32.mrb[1].mxu0  ;;  %v465_v50 = vsel %vm456_vm10, %v402_v31, 0.0 }
 0x1a9   : > { %v423_v34 = vpop.xlane.xlu0 %422 }
 0x1aa   : > { %v424_v35 = vmax.f32 %v421_v33, %v423_v34 }
 0x1ac   : > { %v435_v36 = vsub.f32 %v421_v33, %v424_v35  ;;  %444 = vst.msk [vmem:[#allocation2] sm:$0xff] %vm262_vm3, %v424_v35  ;;  %427 = vperm.xlu0 %733, %v424_v35  }
 0x1ae   : > { %v436_v51 = vmul.f32 1.442695, %v435_v36 }
 0x1b3   : > { %v473_v3 = vld [vmem:[#allocation2] sm:$0xff] }
 0x22b   : > { %v428_v38 = vpop.permute.xlu0 %427 }
 0x22c   : > { %v430_v40 = vsub.f32 %v402_v31, %v428_v38 }
 0x22e   : > { %v431_v42 = vmul.f32 1.442695, %v430_v40 }
 0x230   : > { %735 = vpow2.f32 %v431_v42 }
 0x231   : > { %737 = vpow2.f32 %v436_v51 }
 0x23a   : > { %v736_v47 = vpop.eup %735 }
 0x23b   : > { %v433_v48 = vsel %vm420_vm6, 0.0, %v736_v47  ;;  %v738_v52 = vpop.eup %737 }
 0x23c   : > { %439 = vadd.xlane.f32.xlu1 %v433_v48  ;;  %v438_v54 = vmul.f32 %v738_v52, %v434_v53 }
 0x240   : > { %460 = vadd.xlane.f32.xlu1 %v616_v49 }
 0x244   : > { %466 = vadd.xlane.f32.xlu1 %v465_v50 }
 0x2c9   : > { %v440_v55 = vpop.xlane.xlu1 %439 }
 0x2ca   : > { %v441_v56 = vadd.f32 %v440_v55, %v438_v54 }
 0x2cc   : > { %443 = vst.msk [vmem:[#allocation3] sm:$0xff] %vm262_vm3, %v441_v56 }
 0x2cd   : > { %v461_v58 = vpop.xlane.xlu1 %460 }
 0x2ce   : > { %v462_v59 = vadd.f32 %v461_v58, %v457_v57 }
 0x2d0   : > { %463 = vst.msk [vmem:[#allocation4] sm:$0xff] %vm262_vm3, %v462_v59 }
 0x2d1   : > { %v467_v61 = vpop.xlane.xlu1 %466 }
 0x2d2   : > { %v468_v62 = vadd.f32 %v467_v61, %v464_v60 }
 0x2d3   : > { %v474_v63 = vld [vmem:[#allocation3] sm:$0xff] }
 0x2d4   : > { %739 = vlog2.f32 %v474_v63  ;;  %469 = vst.msk [vmem:[#allocation5] sm:$0xff] %vm262_vm3, %v468_v62 }
 0x2d7   : > { %v478_v0 = vld [vmem:[#allocation4] sm:$0xff] }
 0x2d8   : > { %741 = vrcp.f32 %v478_v0 }
 0x2db   : > { %v479_v7 = vld [vmem:[#allocation5] sm:$0xff] }
 0x2de   : > { %v740_v1 = vpop.eup %739 }
 0x2df   : > { %v476_v2 = vmul.f32 0.6931472, %v740_v1 }
 0x2e1   : > { %v477_v4 = vadd.f32 %v476_v2, %v473_v3 }
 0x2e2   : > { %v742_v6 = vpop.eup %741 }
 0x2e3   : > { %v480_v5 = vmul.f32 %v478_v0, %v477_v4 }
 0x2e5   : > { %v481_v8 = vsub.f32 %v479_v7, %v480_v5 }
 0x2e7   : > { %v483_v9 = vmul.f32 %v742_v6, %v481_v8 }
 0x2e9   : > { %v484_v10 = vmul.f32 -1.0, %v483_v9 }
 0x2eb   : > { %485 = vst.msk [vmem:[%s257_s23] sm:$0xff] %vm262_vm3, %v484_v10 }
 0x2ec PF: > { %s14_s17 = sadd.s32 1, %s765_s17   ;;  %s943_s15 = smov %s761_s16 }
 0x2ed   : > { %p11_p6 = scmp.ge.s32.totalorder %s14_s17, 4   ;;  %s944_s16 = smov %s946_s18 }
 0x2ef   :  { %13 = sbr.rel (!%p11_p6) target bundleno = 2 (0x2), region = 83 }

</bundles_post_ra>
